<compile_context>
chip_gen: v5e
topology: v5e:2x2
jax: 0.10.0
libtpu: 0.0.40
codegen_flags: <defaults>
</compile_context>

<pallas_src>
from collections import namedtuple
from functools import partial

import jax
import jax.numpy as jnp
import numpy as np
from jax.experimental import pallas as pl
from jax.experimental.pallas import tpu as pltpu

FieldConfig = namedtuple("FieldConfig", ["vocab_size"])

TANH_GAIN = 5.0 / 3.0  # nn.init.calculate_gain('tanh')


def _round_up(x, m):
    return -(-x // m) * m


# ----------------------------- Pallas kernel ------------------------------

def make_dcn_kernel(cross_num, dnn_num, matmul_dtype):
    """Fused CrossNet + DNN + final-linear kernel (batch on the lane axis).

    Ref order:
      x_ref     : (D, TB)        flattened feature-embedding tile (act dtype)
      ck_ref    : (D, L)   f32   CrossNet kernels, feature-major
      cb_ref    : (D, L)   f32   CrossNet biases, feature-major
      dnn_w[i]  : (Ho, Hi) matmul_dtype  DNN layer weights (torch layout)
      dnn_b[i]  : (Ho, 1)  f32   DNN layer biases
      fwc_ref   : (D, 1)   f32   final-linear weights, cross branch (column)
      fwd_ref   : (H, 1)   f32   final-linear weights, deep branch (column)
      out_ref   : (1, TB)  f32   per-example logits (lane-dense)
    """

    def kernel(*refs):
        idx = 0
        x_ref = refs[idx]; idx += 1
        ck_ref = refs[idx]; idx += 1
        cb_ref = refs[idx]; idx += 1
        dnn_w = refs[idx:idx + dnn_num]; idx += dnn_num
        dnn_b = refs[idx:idx + dnn_num]; idx += dnn_num
        fwc_ref = refs[idx]; idx += 1
        fwd_ref = refs[idx]; idx += 1
        out_ref = refs[idx]

        # Upcast once; elementwise / tanh math stays f32 (no bf16 VPU/EUP on v5e).
        x0 = x_ref[...].astype(jnp.float32)               # (D, TB)

        # --- CrossNet (vector parameterization) --------------------------
        # torch: s = <x1, w_i> (scalar per example); x1 <- x0 * s + b_i + x1.
        # M=1 MXU dots replaced by VPU multiply + sublane (XLU) reduce.
        x1 = x0
        for i in range(cross_num):
            s = jnp.sum(ck_ref[:, i:i + 1] * x1, axis=0, keepdims=True)  # (1, TB)
            x1 = x0 * s + cb_ref[:, i:i + 1] + x1          # (D, TB)

        # --- DNN tower (Linear + Tanh per layer) --------------------------
        # bf16 operands on the MXU with f32 accumulation; bias + tanh in f32.
        # TODO(synk): nn.Dropout is treated as eval-mode identity.
        h = x0
        for i in range(dnn_num):
            h = jnp.tanh(
                jnp.dot(dnn_w[i][...], h.astype(matmul_dtype),
                        preferred_element_type=jnp.float32)
                + dnn_b[i][...])                           # (H_out, TB)

        # --- final linear head, lane-dense (1, TB) output -----------------
        # final(cat(cross, deep)) == <w_cross, x1> + <w_deep, h>, per lane.
        out_ref[...] = (jnp.sum(fwc_ref[...] * x1, axis=0, keepdims=True)
                        + jnp.sum(fwd_ref[...] * h, axis=0, keepdims=True))

    return kernel


def _choose_tb(B, D, Hmax, act_itemsize, tb):
    """Pick a lane-dense batch tile from an explicit per-step VMEM budget."""
    if tb is None:
        # ~8 MiB activation budget per grid step: double-buffered (D, tb)
        # input stream + double-buffered (1, tb) f32 output + x0/x1/h f32
        # intermediates.  Well under the 32 MiB scoped limit we set below and
        # under half of v7x's 64 MiB physical VMEM once (tiny, resident)
        # weight buffers are added.
        budget = 8 * 1024 * 1024
        per_col = 2 * D * act_itemsize + 2 * 4 + (2 * D + Hmax) * 4
        tb = budget // per_col
    tb = max(128, min(int(tb), 8192))
    tb = (tb // 128) * 128                 # always a multiple of 128 (lane-dense)
    tb = min(tb, _round_up(B, 128))
    # Prefer >= 2 grid steps so v7x's two TensorCores both get work.
    if B > 128 and pl.cdiv(B, tb) < 2:
        tb = _round_up(pl.cdiv(B, 2), 128)
    return tb


def dcn_pallas(fea_emb_t, params, *, act_dtype=jnp.bfloat16, tb=None):
    """CrossNet + DNN + final head on the transposed embedding fea_emb_t (D, B)."""
    D, B = fea_emb_t.shape
    ck_t = params["cross_kernels_T"].astype(jnp.float32)        # (D, L)
    cb_t = params["cross_bias_T"].astype(jnp.float32)           # (D, L)
    dnn_ws = [w.astype(act_dtype) for w in params["dnn_weights"]]    # (Ho, Hi)
    dnn_bs = [b.astype(jnp.float32) for b in params["dnn_biases"]]   # (Ho, 1)
    fw_cross = params["final_w_cross"].astype(jnp.float32)      # (D, 1)
    fw_dnn = params["final_w_dnn"].astype(jnp.float32)          # (H, 1)

    cross_num = ck_t.shape[1]
    dnn_num = len(dnn_ws)
    Hmax = max([D] + [w.shape[0] for w in dnn_ws])

    x = fea_emb_t.astype(act_dtype)                             # (D, B), no pad copy
    tb = _choose_tb(B, D, Hmax, jnp.dtype(act_dtype).itemsize, tb)
    grid = (pl.cdiv(B, tb),)                                    # ragged last block OK

    const = lambda i: (0, 0)
    in_specs = (
        [pl.BlockSpec((D, tb), lambda i: (0, i))]
        + [pl.BlockSpec(ck_t.shape, const), pl.BlockSpec(cb_t.shape, const)]
        + [pl.BlockSpec(w.shape, const) for w in dnn_ws]
        + [pl.BlockSpec(b.shape, const) for b in dnn_bs]
        + [pl.BlockSpec(fw_cross.shape, const),
           pl.BlockSpec(fw_dnn.shape, const)]
    )

    out = pl.pallas_call(
        make_dcn_kernel(cross_num, dnn_num, act_dtype),
        out_shape=jax.ShapeDtypeStruct((1, B), jnp.float32),
        grid=grid,
        in_specs=in_specs,
        out_specs=pl.BlockSpec((1, tb), lambda i: (0, i)),
        compiler_params=pltpu.CompilerParams(
            dimension_semantics=("parallel",),
            vmem_limit_bytes=32 * 1024 * 1024),
    )(x, ck_t, cb_t, *dnn_ws, *dnn_bs, fw_cross, fw_dnn)

    return out[0, :]                                            # (B,)


# ------------------------- parameter init / glue ---------------------------

def xavier_uniform(key, shape, gain):
    # torch layout: (fan_out, fan_in)
    fan_out, fan_in = shape
    bound = gain * np.sqrt(6.0 / (fan_in + fan_out))
    return jax.random.uniform(key, shape, jnp.float32, -bound, bound)


def init_params(key, size_list, embedding_size, hidden_dim, hidden_num, cross_num):
    num_fields = len(size_list)
    D = num_fields * embedding_size
    ks = jax.random.split(key, 6)

    # FeatureEmbedding: xavier_uniform(tanh gain) on Embedding / Linear weights.
    # Store the torch layout (reference) and a pre-transposed copy (kernel glue).
    emb, emb_t = [], []
    for i, fc in enumerate(size_list):
        k = jax.random.fold_in(ks[0], i)
        if fc.vocab_size > 1:
            w = xavier_uniform(k, (fc.vocab_size, embedding_size), TANH_GAIN)
            emb.append(w)           # (V, E)
            emb_t.append(w.T)       # (E, V), pre-transposed once
        else:
            w = xavier_uniform(k, (embedding_size, 1), TANH_GAIN)
            emb.append(w)           # (E, 1)
            emb_t.append(w)         # (E, 1)

    # CrossNet: nn.Parameter(torch.randn(...)).  The xavier loop in the torch
    # code only visits Modules, never raw Parameters, so these stay N(0, 1).
    ck_t = jax.random.normal(ks[1], (D, cross_num), jnp.float32)   # (D, L)
    cb_t = jax.random.normal(ks[2], (D, cross_num), jnp.float32)   # (D, L)

    # DNN tower: xavier weights (tanh gain), torch-default uniform biases.
    dims = [D] + [hidden_dim] * hidden_num
    dnn_ws, dnn_bs = [], []
    for i in range(hidden_num):
        kw = jax.random.fold_in(ks[3], i)
        kb = jax.random.fold_in(ks[4], i)
        fan_in, fan_out = dims[i], dims[i + 1]
        dnn_ws.append(xavier_uniform(kw, (fan_out, fan_in), TANH_GAIN))
        bb = 1.0 / np.sqrt(fan_in)
        dnn_bs.append(jax.random.uniform(kb, (fan_out, 1), jnp.float32, -bb, bb))

    # Final head: nn.Linear(D + hidden_dim, 1, bias=False), torch default init,
    # stored split & transposed as (D, 1) / (H, 1) column vectors.
    fan_in = D + hidden_dim
    fb = 1.0 / np.sqrt(fan_in)
    fw = jax.random.uniform(ks[5], (1, fan_in), jnp.float32, -fb, fb)

    return {
        "embeddings": emb,
        "embeddings_T": emb_t,
        "cross_kernels_T": ck_t,
        "cross_bias_T": cb_t,
        "dnn_weights": dnn_ws,
        "dnn_biases": dnn_bs,
        "final_w_cross": fw[:, :D].T,     # (D, 1)
        "final_w_dnn": fw[:, D:].T,       # (H, 1)
    }


def feature_embedding_forward_T(X, emb_t_params, size_list, act_dtype):
    """Embedding glue that emits fea_emb already transposed: (D, B), D = F*E.

    Gathers from pre-transposed (E, V) tables along axis=1 and concatenates the
    per-field (E, B) slices directly in the kernel's layout and dtype, avoiding
    the (B, D) materialization + extra transpose/pad HBM passes.
    """
    cols = []
    for i, fc in enumerate(size_list):
        if fc.vocab_size == 1:
            x = X[:, i]                                                  # (B,)
            cols.append((emb_t_params[i] * x[None, :]).astype(act_dtype))        # (E, B)
        else:
            idx = X[:, i].astype(jnp.int32)                              # .long()
            cols.append(jnp.take(emb_t_params[i], idx, axis=1).astype(act_dtype))  # (E, B)
    return jnp.concatenate(cols, axis=0)                                 # (D, B)


@partial(jax.jit, static_argnames=("size_list", "act_dtype", "tb"))
def dcn_forward(X, params, size_list, *, act_dtype=jnp.bfloat16, tb=None):
    fea_t = feature_embedding_forward_T(X, params["embeddings_T"], size_list, act_dtype)
    return dcn_pallas(fea_t, params, act_dtype=act_dtype, tb=tb)          # (B,)


# ------------------------------- reference ---------------------------------

def feature_embedding_forward(X, emb_params, size_list):
    # Torch-layout glue for the reference: (B, F, E).
    outs = []
    for i, fc in enumerate(size_list):
        if fc.vocab_size == 1:
            x = X[:, i:i + 1]                                  # (B, 1)
            outs.append(x * emb_params[i][:, 0][None, :])      # (B, E) == Linear(1, E)
        else:
            idx = X[:, i].astype(jnp.int32)
            outs.append(jnp.take(emb_params[i], idx, axis=0))  # (B, E)
    return jnp.stack(outs, axis=1)                             # (B, F, E)


def dcn_forward_ref(X, params, size_list, *, act_dtype=jnp.float32):
    """Pure-JAX reference of the PyTorch DCN forward (eval-mode dropout).

    With act_dtype == bfloat16 it applies the same explicit bf16 roundings the
    kernel applies (activation transfer + DNN matmul operands) while keeping
    f32 accumulation, so the comparison stays tight.
    """
    hp = jax.lax.Precision.HIGHEST
    fea = feature_embedding_forward(X, params["embeddings"], size_list)
    x0 = fea.reshape(fea.shape[0], -1).astype(act_dtype).astype(jnp.float32)  # (B, D)

    # CrossNet (vector parameterization)
    ck = params["cross_kernels_T"]          # (D, L)
    cb = params["cross_bias_T"]             # (D, L)
    x1 = x0
    for i in range(ck.shape[1]):
        s = jnp.dot(x1, ck[:, i], precision=hp)                         # (B,)
        x1 = x0 * s[:, None] + cb[:, i][None, :] + x1

    # DNN tower
    h = x0
    for W, b in zip(params["dnn_weights"], params["dnn_biases"]):
        Wq = W.astype(act_dtype).astype(jnp.float32)
        hq = h.astype(act_dtype).astype(jnp.float32)
        h = jnp.tanh(jnp.dot(hq, Wq.T, precision=hp) + b[:, 0][None, :])

    # Final head (split over the concatenated [cross, deep] input)
    return (jnp.dot(x1, params["final_w_cross"][:, 0], precision=hp)
            + jnp.dot(h, params["final_w_dnn"][:, 0], precision=hp))


# ---------------------------------- main -----------------------------------

if __name__ == "__main__":
    key = jax.random.PRNGKey(0)

    # Field configuration: 3 categorical fields + 1 continuous field.
    size_tuple_list = (FieldConfig(10), FieldConfig(1), FieldConfig(7), FieldConfig(5))
    embedding_size = 8       # D = 4 * 8 = 32
    hidden_dim = 32
    hidden_num = 2
    cross_num = 3
    B = 256

    k_params, k_x = jax.random.split(key)
    params = init_params(k_params, size_tuple_list, embedding_size,
                         hidden_dim, hidden_num, cross_num)

    # Build X: categorical fields -> integer-valued floats; continuous -> floats.
    cols = []
    for i, fc in enumerate(size_tuple_list):
        kx = jax.random.fold_in(k_x, i)
        if fc.vocab_size > 1:
            cols.append(jax.random.randint(kx, (B,), 0, fc.vocab_size).astype(jnp.float32))
        else:
            cols.append(jax.random.normal(kx, (B,), jnp.float32))
    X = jnp.stack(cols, axis=1)  # (B, F)

    # bf16 activation transfer (production default).  At B=256 the budget
    # heuristic picks tb=128 -> a 2-step "parallel" grid (exercises pipelining
    # and keeps both v7x TensorCores busy).  Compared against a reference that
    # applies the same explicit bf16 roundings with f32 accumulation.
    out_bf16 = jax.block_until_ready(dcn_forward(X, params, size_tuple_list))
    ref_bf16 = dcn_forward_ref(X, params, size_tuple_list, act_dtype=jnp.bfloat16)
    np.testing.assert_allclose(np.asarray(out_bf16), np.asarray(ref_bf16),
                               rtol=5e-3, atol=5e-3)

    # Full-f32 path reproduces the torch (eval-mode) forward numerics tightly.
    out_f32 = jax.block_until_ready(
        dcn_forward(X, params, size_tuple_list, act_dtype=jnp.float32))
    ref_f32 = dcn_forward_ref(X, params, size_tuple_list, act_dtype=jnp.float32)
    np.testing.assert_allclose(np.asarray(out_f32), np.asarray(ref_f32),
                               rtol=1e-3, atol=1e-3)

    assert out_bf16.shape == (B,)
    print("KERNEL_OK")
</pallas_src>

<mosaic_0001>
module attributes {stable_mosaic.version = 11 : i64} {
  func.func @kernel(%arg0: i32, %arg1: memref<32x128xbf16, #tpu.memory_space<vmem>>, %arg2: memref<32x3xf32, #tpu.memory_space<vmem>>, %arg3: memref<32x3xf32, #tpu.memory_space<vmem>>, %arg4: memref<32x32xbf16, #tpu.memory_space<vmem>>, %arg5: memref<32x32xbf16, #tpu.memory_space<vmem>>, %arg6: memref<32x1xf32, #tpu.memory_space<vmem>>, %arg7: memref<32x1xf32, #tpu.memory_space<vmem>>, %arg8: memref<32x1xf32, #tpu.memory_space<vmem>>, %arg9: memref<32x1xf32, #tpu.memory_space<vmem>>, %arg10: memref<1x128xf32, #tpu.memory_space<vmem>>) attributes {dimension_semantics = [#tpu.dimension_semantics<parallel>], iteration_bounds = array<i64: 2>, scalar_prefetch = 0 : i64, scratch_operands = 0 : i64, tpu.core_type = #tpu.core_type<tc>, window_params = [{transform_indices = @transform_0, window_bounds = array<i64: 32, 128>}, {pipeline_mode = #tpu.pipeline_mode<synchronous>, transform_indices = @transform_1, window_bounds = array<i64: 32, 3>}, {pipeline_mode = #tpu.pipeline_mode<synchronous>, transform_indices = @transform_2, window_bounds = array<i64: 32, 3>}, {pipeline_mode = #tpu.pipeline_mode<synchronous>, transform_indices = @transform_3, window_bounds = array<i64: 32, 32>}, {pipeline_mode = #tpu.pipeline_mode<synchronous>, transform_indices = @transform_4, window_bounds = array<i64: 32, 32>}, {pipeline_mode = #tpu.pipeline_mode<synchronous>, transform_indices = @transform_5, window_bounds = array<i64: 32, 1>}, {pipeline_mode = #tpu.pipeline_mode<synchronous>, transform_indices = @transform_6, window_bounds = array<i64: 32, 1>}, {pipeline_mode = #tpu.pipeline_mode<synchronous>, transform_indices = @transform_7, window_bounds = array<i64: 32, 1>}, {pipeline_mode = #tpu.pipeline_mode<synchronous>, transform_indices = @transform_8, window_bounds = array<i64: 32, 1>}, {transform_indices = @transform_9, window_bounds = array<i64: 1, 128>}]} {
    %c0 = arith.constant 0 : index
    %c0_0 = arith.constant 0 : index
    %0 = vector.load %arg1[%c0, %c0_0] : memref<32x128xbf16, #tpu.memory_space<vmem>>, vector<32x128xbf16>
    %1 = arith.extf %0 : vector<32x128xbf16> to vector<32x128xf32>
    %c0_1 = arith.constant 0 : index
    %c0_2 = arith.constant 0 : index
    %2 = vector.load %arg2[%c0_1, %c0_2] : memref<32x3xf32, #tpu.memory_space<vmem>>, vector<32x1xf32>
    %3 = vector.broadcast %2 : vector<32x1xf32> to vector<32x128xf32>
    %4 = arith.mulf %3, %1 : vector<32x128xf32>
    %cst = arith.constant dense<0.000000e+00> : vector<128xf32>
    %5 = vector.multi_reduction <add>, %4, %cst [0] : vector<32x128xf32> to vector<128xf32>
    %6 = vector.shape_cast %5 : vector<128xf32> to vector<1x128xf32>
    %7 = vector.broadcast %6 : vector<1x128xf32> to vector<32x128xf32>
    %8 = arith.mulf %1, %7 : vector<32x128xf32>
    %c0_3 = arith.constant 0 : index
    %c0_4 = arith.constant 0 : index
    %9 = vector.load %arg3[%c0_3, %c0_4] : memref<32x3xf32, #tpu.memory_space<vmem>>, vector<32x1xf32>
    %10 = vector.broadcast %9 : vector<32x1xf32> to vector<32x128xf32>
    %11 = arith.addf %8, %10 : vector<32x128xf32>
    %12 = arith.addf %11, %1 : vector<32x128xf32>
    %c0_5 = arith.constant 0 : index
    %c1 = arith.constant 1 : index
    %13 = vector.load %arg2[%c0_5, %c1] : memref<32x3xf32, #tpu.memory_space<vmem>>, vector<32x1xf32>
    %14 = vector.broadcast %13 : vector<32x1xf32> to vector<32x128xf32>
    %15 = arith.mulf %14, %12 : vector<32x128xf32>
    %cst_6 = arith.constant dense<0.000000e+00> : vector<128xf32>
    %16 = vector.multi_reduction <add>, %15, %cst_6 [0] : vector<32x128xf32> to vector<128xf32>
    %17 = vector.shape_cast %16 : vector<128xf32> to vector<1x128xf32>
    %18 = vector.broadcast %17 : vector<1x128xf32> to vector<32x128xf32>
    %19 = arith.mulf %1, %18 : vector<32x128xf32>
    %c0_7 = arith.constant 0 : index
    %c1_8 = arith.constant 1 : index
    %20 = vector.load %arg3[%c0_7, %c1_8] : memref<32x3xf32, #tpu.memory_space<vmem>>, vector<32x1xf32>
    %21 = vector.broadcast %20 : vector<32x1xf32> to vector<32x128xf32>
    %22 = arith.addf %19, %21 : vector<32x128xf32>
    %23 = arith.addf %22, %12 : vector<32x128xf32>
    %c0_9 = arith.constant 0 : index
    %c2 = arith.constant 2 : index
    %24 = vector.load %arg2[%c0_9, %c2] : memref<32x3xf32, #tpu.memory_space<vmem>>, vector<32x1xf32>
    %25 = vector.broadcast %24 : vector<32x1xf32> to vector<32x128xf32>
    %26 = arith.mulf %25, %23 : vector<32x128xf32>
    %cst_10 = arith.constant dense<0.000000e+00> : vector<128xf32>
    %27 = vector.multi_reduction <add>, %26, %cst_10 [0] : vector<32x128xf32> to vector<128xf32>
    %28 = vector.shape_cast %27 : vector<128xf32> to vector<1x128xf32>
    %29 = vector.broadcast %28 : vector<1x128xf32> to vector<32x128xf32>
    %30 = arith.mulf %1, %29 : vector<32x128xf32>
    %c0_11 = arith.constant 0 : index
    %c2_12 = arith.constant 2 : index
    %31 = vector.load %arg3[%c0_11, %c2_12] : memref<32x3xf32, #tpu.memory_space<vmem>>, vector<32x1xf32>
    %32 = vector.broadcast %31 : vector<32x1xf32> to vector<32x128xf32>
    %33 = arith.addf %30, %32 : vector<32x128xf32>
    %34 = arith.addf %33, %23 : vector<32x128xf32>
    %c0_13 = arith.constant 0 : index
    %c0_14 = arith.constant 0 : index
    %35 = vector.load %arg4[%c0_13, %c0_14] : memref<32x32xbf16, #tpu.memory_space<vmem>>, vector<32x32xbf16>
    %36 = arith.truncf %1 : vector<32x128xf32> to vector<32x128xbf16>
    %cst_15 = arith.constant dense<0.000000e+00> : vector<32x128xf32>
    %37 = tpu.matmul %35, %36, %cst_15 {dimension_numbers = #tpu.dot_dimension_numbers<[1], [0], [0], [1], [0, 0, 1, 1], [], []>} : vector<32x32xbf16>, vector<32x128xbf16>, vector<32x128xf32> -> vector<32x128xf32>
    %c0_16 = arith.constant 0 : index
    %c0_17 = arith.constant 0 : index
    %38 = vector.load %arg6[%c0_16, %c0_17] : memref<32x1xf32, #tpu.memory_space<vmem>>, vector<32x1xf32>
    %39 = vector.broadcast %38 : vector<32x1xf32> to vector<32x128xf32>
    %40 = arith.addf %37, %39 : vector<32x128xf32>
    %41 = math.tanh %40 : vector<32x128xf32>
    %c0_18 = arith.constant 0 : index
    %c0_19 = arith.constant 0 : index
    %42 = vector.load %arg5[%c0_18, %c0_19] : memref<32x32xbf16, #tpu.memory_space<vmem>>, vector<32x32xbf16>
    %43 = arith.truncf %41 : vector<32x128xf32> to vector<32x128xbf16>
    %cst_20 = arith.constant dense<0.000000e+00> : vector<32x128xf32>
    %44 = tpu.matmul %42, %43, %cst_20 {dimension_numbers = #tpu.dot_dimension_numbers<[1], [0], [0], [1], [0, 0, 1, 1], [], []>} : vector<32x32xbf16>, vector<32x128xbf16>, vector<32x128xf32> -> vector<32x128xf32>
    %c0_21 = arith.constant 0 : index
    %c0_22 = arith.constant 0 : index
    %45 = vector.load %arg7[%c0_21, %c0_22] : memref<32x1xf32, #tpu.memory_space<vmem>>, vector<32x1xf32>
    %46 = vector.broadcast %45 : vector<32x1xf32> to vector<32x128xf32>
    %47 = arith.addf %44, %46 : vector<32x128xf32>
    %48 = math.tanh %47 : vector<32x128xf32>
    %c0_23 = arith.constant 0 : index
    %c0_24 = arith.constant 0 : index
    %49 = vector.load %arg8[%c0_23, %c0_24] : memref<32x1xf32, #tpu.memory_space<vmem>>, vector<32x1xf32>
    %50 = vector.broadcast %49 : vector<32x1xf32> to vector<32x128xf32>
    %51 = arith.mulf %50, %34 : vector<32x128xf32>
    %cst_25 = arith.constant dense<0.000000e+00> : vector<128xf32>
    %52 = vector.multi_reduction <add>, %51, %cst_25 [0] : vector<32x128xf32> to vector<128xf32>
    %53 = vector.shape_cast %52 : vector<128xf32> to vector<1x128xf32>
    %c0_26 = arith.constant 0 : index
    %c0_27 = arith.constant 0 : index
    %54 = vector.load %arg9[%c0_26, %c0_27] : memref<32x1xf32, #tpu.memory_space<vmem>>, vector<32x1xf32>
    %55 = vector.broadcast %54 : vector<32x1xf32> to vector<32x128xf32>
    %56 = arith.mulf %55, %48 : vector<32x128xf32>
    %cst_28 = arith.constant dense<0.000000e+00> : vector<128xf32>
    %57 = vector.multi_reduction <add>, %56, %cst_28 [0] : vector<32x128xf32> to vector<128xf32>
    %58 = vector.shape_cast %57 : vector<128xf32> to vector<1x128xf32>
    %59 = arith.addf %53, %58 : vector<1x128xf32>
    %c0_29 = arith.constant 0 : index
    %c0_30 = arith.constant 0 : index
    %60 = vector.load %arg10[%c0_29, %c0_30] : memref<1x128xf32, #tpu.memory_space<vmem>>, vector<1x128xf32>
    tpu.vector_store %arg10[%c0_29, %c0_30], %59 {strides = array<i32>} : memref<1x128xf32, #tpu.memory_space<vmem>>, vector<1x128xf32>,
    return
  }
  func.func @transform_0(%arg0: i32) -> (i32, i32) {
    %c0_i32 = arith.constant 0 : i32
    %c0_i32_0 = arith.constant 0 : i32
    return %c0_i32, %arg0 : i32, i32
  }
  func.func @transform_1(%arg0: i32) -> (i32, i32) {
    %c0_i32 = arith.constant 0 : i32
    %c0_i32_0 = arith.constant 0 : i32
    %c0_i32_1 = arith.constant 0 : i32
    return %c0_i32, %c0_i32_0 : i32, i32
  }
  func.func @transform_2(%arg0: i32) -> (i32, i32) {
    %c0_i32 = arith.constant 0 : i32
    %c0_i32_0 = arith.constant 0 : i32
    %c0_i32_1 = arith.constant 0 : i32
    return %c0_i32, %c0_i32_0 : i32, i32
  }
  func.func @transform_3(%arg0: i32) -> (i32, i32) {
    %c0_i32 = arith.constant 0 : i32
    %c0_i32_0 = arith.constant 0 : i32
    %c0_i32_1 = arith.constant 0 : i32
    return %c0_i32, %c0_i32_0 : i32, i32
  }
  func.func @transform_4(%arg0: i32) -> (i32, i32) {
    %c0_i32 = arith.constant 0 : i32
    %c0_i32_0 = arith.constant 0 : i32
    %c0_i32_1 = arith.constant 0 : i32
    return %c0_i32, %c0_i32_0 : i32, i32
  }
  func.func @transform_5(%arg0: i32) -> (i32, i32) {
    %c0_i32 = arith.constant 0 : i32
    %c0_i32_0 = arith.constant 0 : i32
    %c0_i32_1 = arith.constant 0 : i32
    return %c0_i32, %c0_i32_0 : i32, i32
  }
  func.func @transform_6(%arg0: i32) -> (i32, i32) {
    %c0_i32 = arith.constant 0 : i32
    %c0_i32_0 = arith.constant 0 : i32
    %c0_i32_1 = arith.constant 0 : i32
    return %c0_i32, %c0_i32_0 : i32, i32
  }
  func.func @transform_7(%arg0: i32) -> (i32, i32) {
    %c0_i32 = arith.constant 0 : i32
    %c0_i32_0 = arith.constant 0 : i32
    %c0_i32_1 = arith.constant 0 : i32
    return %c0_i32, %c0_i32_0 : i32, i32
  }
  func.func @transform_8(%arg0: i32) -> (i32, i32) {
    %c0_i32 = arith.constant 0 : i32
    %c0_i32_0 = arith.constant 0 : i32
    %c0_i32_1 = arith.constant 0 : i32
    return %c0_i32, %c0_i32_0 : i32, i32
  }
  func.func @transform_9(%arg0: i32) -> (i32, i32) {
    %c0_i32 = arith.constant 0 : i32
    %c0_i32_0 = arith.constant 0 : i32
    return %c0_i32, %arg0 : i32, i32
  }
}

</mosaic_0001>

<bundles_post_ra>
// kernel: dcn_forward.1
= control target key start
LH: loop header
LB: loop body
LE: loop exit
PB: predicated region body
PF: predicated region fallthrough
CT: control target
= control target key end

     0   :  { %14 = vsyncpa [#allocation4], 0  ;;  %s1337_s0 = inlined_call_operand.vmem [shape: bf16[32,256], index: 0, kind: input, shape index: {}]   ;;  %s1338_s1 = inlined_call_operand.vmem [shape: f32[32,3], index: 1, kind: input, shape index: {}]   ;;  %s1339_s2 = inlined_call_operand.vmem [shape: f32[32,3], index: 2, kind: input, shape index: {}]   ;;  %s1340_s3 = inlined_call_operand.vmem [shape: bf16[32,32], index: 3, kind: input, shape index: {}]   ;;  %s1341_s4 = inlined_call_operand.vmem [shape: bf16[32,32], index: 4, kind: input, shape index: {}]   ;;  %s1342_s5 = inlined_call_operand.vmem [shape: f32[32,1], index: 5, kind: input, shape index: {}]   ;;  %s1343_s6 = inlined_call_operand.vmem [shape: f32[32,1], index: 6, kind: input, shape index: {}]   ;;  %s1344_s7 = inlined_call_operand.vmem [shape: f32[32,1], index: 7, kind: input, shape index: {}]   ;;  %s1345_s8 = inlined_call_operand.vmem [shape: f32[32,1], index: 8, kind: input, shape index: {}]   ;;  %s1346_s9 = inlined_call_operand.hbm [shape: f32[1,256], index: 9, kind: output, shape index: {}]  }
   0x1   :  { %16 = vsyncpa [#allocation4 + $0x1], 0  ;;  %s1114_s30 = smov 0   ;;  %s1116_s10 = smov 0  }
   0x2   :  { %s1118_s11 = smov 0   ;;  %s1120_s12 = smov 0  }
   0x3 LB: > { %s879_s13 = sadd.s32 4294967295, %s1059_s12   ;;  %s880_s14 = sadd.s32 4294967294, %s1059_s12   ;;  %s1059_s12 = sphi %s1120_s12, %s1352_s12   ;;  %s1055_s11 = sphi %s1118_s11, %s1351_s11   ;;  %s1051_s10 = sphi %s1116_s10, %s1350_s10   ;;  %s1047_s30 = sphi %s1114_s30, %s1349_s30  }
   0x4   : > { %s1137_s15 = sadd.s32 1, %s1059_s12   ;;  %s29_s16 = sadd.s32 1, %s1055_s11 }
   0x5   : > { %s26_s17 = ssub.s32 %s1059_s12, %s1137_s15  ;;  %p36_p0 = scmp.ne.s32.totalorder %s1055_s11, %s1051_s10 }
   0x6   : > { %p27_p1 = scmp.eq.s32.totalorder %s26_s17, 0  ;;  %p37_p2 = scmp.eq.s32.totalorder %s1059_s12, 0 }
   0x7   : > { %p234_p3 = scmp.eq.s32.totalorder %s879_s13, 1  ;;  %p239_p4 = scmp.ne.s32.totalorder %s1051_s10, %s1047_s30 }
   0x8   : > { %s1150_s18 = scalar_select %p27_p1, %s1055_s11, %s29_s16  }
   0x9   : > { %p38_p5 = por %p37_p2, %p36_p0  ;;  %p1152_p6 = por %p234_p3, %p36_p0 }
   0xa   : > { %p240_p7 = scmp.eq.s32.totalorder %s880_s14, 1  ;;  %p882_p9 = scmp.ge.s32.totalorder %s1059_s12, 2 }
   0xc   : > { %p1156_p8 = por %p240_p7, %p239_p4  ;;  %280 = sbr.rel (%p882_p9) target bundleno = 25 (0x19), region = 48 }
  0x11   : > { %283 = sbr.rel (!%p38_p5) target bundleno = 25 (0x19), region = 52  ;;  %s285_s21 = sand.u32 (%p38_p5), 1, %s1055_s11  }
  0x12   : > { %s884_s22 = sshll.u32 (%p38_p5), %s1059_s12, 2  ;;  %s883_s23 = sshll.u32 (%p38_p5), %s285_s21, 4 }
  0x13   : > { %s289_s26 = scalar_lea.vmem (%p38_p5), %s1337_s0, %s884_s22  ;;  %s287_s27 = scalar_lea.vmem (%p38_p5), [#allocation2], %s883_s23 }
  0x14   : > { %v306_v0 = vld [vmem:[%s289_s26] sm:$0xf] (%p38_p5)  ;;  %v308_v1 = vld [vmem:[%s289_s26 + $0x8] sm:$0xf] (%p38_p5)  ;;  %v310_v2 = vld [vmem:[%s289_s26 + $0x10] sm:$0xf] (%p38_p5) }
  0x15   : > { %307 = vst [vmem:[%s287_s27] sm:$0xf] (%p38_p5), %v306_v0  ;;  %v312_v3 = vld [vmem:[%s289_s26 + $0x18] sm:$0xf] (%p38_p5) }
  0x16   : > { %309 = vst [vmem:[%s287_s27 + $0x4] sm:$0xf] %v308_v1 }
  0x17   : > { %311 = vst [vmem:[%s287_s27 + $0x8] sm:$0xf] %v310_v2 }
  0x18   : > { %313 = vst [vmem:[%s287_s27 + $0xc] sm:$0xf] %v312_v3 }
  0x19 PF: > { %p885_p10 = scmp.ge.s32.totalorder %s1059_s12, 1  ;;  %p344_p11 = scmp.lt.s32.totalorder %s1059_s12, 3 }
  0x1b   : > { %p345_p12 = pnand %p885_p10, %p344_p11 }
  0x1c   : > { %s1177_s17 = sand.u32 (!%p345_p12), 1, %s1051_s10   ;;  %s815_s25 = scalar_lea.hbm (!%p345_p12), %s1346_s9, %s879_s13 }
  0x1d   : > { %348 = sbr.rel (%p345_p12) target bundleno = 373 (0x175), region = 93  ;;  %s886_s21 = sshll.u32 (!%p345_p12), %s1177_s17, 4 }
  0x1e   : > { %s1185_s24 = scalar_lea.vmem (!%p345_p12), [#allocation2], %s886_s21  ;;  %s384_s26 = scalar_lea.vmem (!%p345_p12), [#allocation3], %s1177_s17 }
  0x1f   : > { %s817_s27 = sshll.u32 (!%p345_p12), %s384_s26, 4  ;;  %s819_s28 = sshll.u32 (!%p345_p12), %s815_s25, 4  ;;  %s818_s27 = int_to_ptr.vmem [resolvable:$true] %s817_s27  ;;  %s820_s28 = int_to_ptr.hbm [resolvable:$true] %s819_s28 }
  0x20   : > { %s807_s29 = scalar_lea.sflag (!%p345_p12), [#allocation4], %s1177_s17  ;;  %s1011_s14 = sshra.s32 (!%p345_p12), %s820_s28, 4  ;;  %s1012_s14 = int_to_ptr.hbm [resolvable:$true] %s1011_s14 }
  0x21   : > { %s1013_s16 = scalar_lea.hbm (!%p345_p12), %s1012_s14, 1  ;;  %p1018_p2 = scmp.lt.s32.totalorder (!%p345_p12), %s1012_s14, %s1346_s9 }
  0x22   : > { %v396_v4 = vld [vmem:[%s1338_s1 + $0x10] sm:$0xff]  ;;  %v394_v5 = vld [vmem:[%s1338_s1] sm:$0xff]  ;;  %v1061_v6 = vmov 0   ;;  %v588_v7 = vld [vmem:[%s1342_s5 + $0x18] sm:$0xff]  ;;  %vm631_vm0 = vcmask 261120   ;;  %v1062_v21 = vmov 1   ;;  %p1014_p13 = scmp.ne.s32.totalorder %s1012_s14, %s1013_s16 }
  0x23   : > { %970 = vset.pattern.permute.xlu1 %v1061_v6  ;;  %969 = vset.pattern.permute.xlu0 %v1061_v6  ;;  %v918_v8 = vld [vmem:[%s1185_s24 + $0x8] sm:$0xff]  ;;  %v917_v9 = vld [vmem:[%s1185_s24] sm:$0xff]  ;;  %v1063_v22 = vmov 2  }
  0x24   : > { %410 = vperm.xlu1 %970, %v396_v4   ;;  %400 = vperm.xlu0 %969, %v394_v5   ;;  %v587_v10 = vld [vmem:[%s1342_s5 + $0x10] sm:$0xff]  ;;  %v395_v11 = vld [vmem:[%s1338_s1 + $0x8] sm:$0xff]  ;;  %v919_v12 = vld [vmem:[%s1340_s3] sm:$0xff]  ;;  %p1015_p0 = pnand %p1014_p13, %p1152_p6 }
  0x25   : > { %971 = vset.pattern.permute.xlu2 %v1061_v6  ;;  %644 = vmatpush.bf16.msra.mxu0 %v918_v8  ;;  %v920_v13 = vld [vmem:[%s1340_s3 + $0x8] sm:$0xff]  ;;  %v585_v14 = vld [vmem:[%s1342_s5] sm:$0xff]  ;;  %v397_v15 = vld [vmem:[%s1338_s1 + $0x18] sm:$0xff] }
  0x26   : > { %606 = vperm.xlu2 %971, %v588_v7   ;;  %923 = vmatpush.bf16.msra.mxu2 %v918_v8  ;;  %v586_v16 = vld [vmem:[%s1342_s5 + $0x8] sm:$0xff]  ;;  %v435_v17 = vld [vmem:[%s1339_s2] sm:$0xff]  ;;  %v437_v18 = vld [vmem:[%s1339_s2 + $0x10] sm:$0xff]  ;;  %p1016_p1 = pneg %p1015_p0 }
  0x27   : > { %v436_v19 = vld [vmem:[%s1339_s2 + $0x8] sm:$0xff]  ;;  %v438_v20 = vld [vmem:[%s1339_s2 + $0x18] sm:$0xff]  ;;  %v667_v23 = vld [vmem:[%s1343_s6] sm:$0xff] }
  0x28   : > { %v731_v24 = vld [vmem:[%s1344_s7 + $0x8] sm:$0xff]  ;;  %v732_v25 = vld [vmem:[%s1344_s7 + $0x10] sm:$0xff]  ;;  %v730_v27 = vld [vmem:[%s1344_s7] sm:$0xff] }
  0x29   : > { %645 = vmatpush.bf16.msra.mxu0 %v917_v9  ;;  %v669_v26 = vld [vmem:[%s1343_s6 + $0x10] sm:$0xff]  ;;  %v768_v28 = vld [vmem:[%s1345_s8 + $0x8] sm:$0xff]  ;;  %v733_v29 = vld [vmem:[%s1344_s7 + $0x18] sm:$0xff] }
  0x2a   : > { %924 = vmatpush.bf16.msra.mxu2 %v917_v9  ;;  %v386_v31 = vld [vmem:[%s1185_s24] sm:$0xff]   ;;  %v388_v32 = vld [vmem:[%s1185_s24 + $0x8] sm:$0xff]   ;;  %s1017_s24 = scalar_lea.hbm %s1346_s9, 2 }
  0x2b   : > { %v1251_v33 = vunpack.c.l.bf16 %v386_v31  ;;  %v1253_v34 = vunpack.c.l.bf16 %v388_v32  ;;  %v1255_v35 = vunpack.c.h.bf16 %v386_v31  ;;  %v668_v36 = vld [vmem:[%s1343_s6 + $0x8] sm:$0xff]  ;;  %v670_v44 = vld [vmem:[%s1343_s6 + $0x18] sm:$0xff]  ;;  %v767_v46 = vld [vmem:[%s1345_s8] sm:$0xff]  ;;  %v1269_v50 = vunpack.c.h.bf16 %v388_v32  ;;  %p1019_p3 = scmp.lt.s32.totalorder %s1017_s24, %s1013_s16 }
  0x2c   : > { %601 = vperm.xlu1 %970, %v587_v10   ;;  %405 = vperm.xlu0 %969, %v395_v11   ;;  %v769_v51 = vld [vmem:[%s1345_s8 + $0x10] sm:$0xff]  ;;  %v770_v53 = vld [vmem:[%s1345_s8 + $0x18] sm:$0xff]  ;;  %v921_v9 = vld [vmem:[%s1341_s4] sm:$0xff] }
  0x2d   : > { %903 = vmatmul.msk.bf16.vlgmr.msra.gmra.mxu0 %vm631_vm0, %v919_v12  ;;  %904 = vmatmul.msk.bf16.vlgmr.msra.gmra.mxu2 %vm631_vm0, %v920_v13  ;;  %v922_v10 = vld [vmem:[%s1341_s4 + $0x8] sm:$0xff]  ;;  %p1020_p4 = por %p1019_p3, %p1018_p2 }
  0x2e   : > { %591 = vperm.xlu2 %971, %v585_v14  }
  0x2f   : > { %p1021_p5 = pnand %p1020_p4, %p1016_p1 }
  0x34   : > { %415 = vperm.xlu1 %970, %v397_v15   ;;  %596 = vperm.xlu0 %969, %v586_v16  }
  0x36   : > { %441 = vperm.xlu2 %971, %v435_v17  }
  0x3c   : > { %451 = vperm.xlu1 %970, %v437_v18   ;;  %446 = vperm.xlu0 %969, %v436_v19  }
  0x3e   : > { %456 = vperm.xlu2 %971, %v438_v20  }
  0x44   : > { %973 = vset.pattern.permute.xlu1 %v1062_v21  ;;  %972 = vset.pattern.permute.xlu0 %v1062_v21 }
  0x45   : > { %472 = vperm.xlu1 %973, %v395_v11   ;;  %468 = vperm.xlu0 %972, %v394_v5  }
  0x46   : > { %974 = vset.pattern.permute.xlu2 %v1062_v21 }
  0x47   : > { %476 = vperm.xlu2 %974, %v396_v4  }
  0x4d   : > { %480 = vperm.xlu1 %973, %v397_v15   ;;  %505 = vperm.xlu0 %972, %v436_v19  }
  0x4f   : > { %501 = vperm.xlu2 %974, %v435_v17  }
  0x55   : > { %509 = vperm.xlu1 %973, %v437_v18   ;;  %975 = vset.pattern.permute.xlu0 %v1063_v22 }
  0x56   : > { %525 = vperm.xlu0 %975, %v394_v5  }
  0x57   : > { %513 = vperm.xlu2 %974, %v438_v20  }
  0x5d   : > { %976 = vset.pattern.permute.xlu1 %v1063_v22 }
  0x5e   : > { %529 = vperm.xlu1 %976, %v395_v11   ;;  %562 = vperm.xlu0 %975, %v436_v19  }
  0x5f   : > { %977 = vset.pattern.permute.xlu2 %v1063_v22 }
  0x60   : > { %533 = vperm.xlu2 %977, %v396_v4  }
  0x66   : > { %537 = vperm.xlu1 %976, %v397_v15   ;;  %978 = vset.pattern.permute.xlu0 %v1061_v6 }
  0x67   : > { %673 = vperm.xlu0 %978, %v667_v23  }
  0x68   : > { %558 = vperm.xlu2 %977, %v435_v17  }
  0x6e   : > { %566 = vperm.xlu1 %976, %v437_v18  }
  0x6f   : > { %741 = vperm.xlu0 %978, %v731_v24  }
  0x70   : > { %570 = vperm.xlu2 %977, %v438_v20  }
  0x76   : > { %979 = vset.pattern.permute.xlu1 %v1061_v6 }
  0x77   : > { %746 = vperm.xlu0 %978, %v732_v25   ;;  %678 = vperm.xlu1 %979, %v668_v36  }
  0x78   : > { %980 = vset.pattern.permute.xlu2 %v1061_v6 }
  0x79   : > { %683 = vperm.xlu2 %980, %v669_v26  }
  0x7f   : > { %688 = vperm.xlu1 %979, %v670_v44   ;;  %788 = vperm.xlu0 %978, %v770_v53  }
  0x80   : > { %v607_v48 = vpop.permute.xlu2 %606 }
  0x81   : > { %736 = vperm.xlu2 %980, %v730_v27  }
  0x87   : > { %773 = vperm.xlu1 %979, %v767_v46  }
  0x88   : > { %v592_v57 = vpop.permute.xlu2 %591 }
  0x89   : > { %778 = vperm.xlu2 %980, %v768_v28  }
  0x8f   : > { %783 = vperm.xlu1 %979, %v769_v51  }
  0x90   : > { %v442_v14 = vpop.permute.xlu2 %441 }
  0x91   : > { %751 = vperm.xlu2 %980, %v733_v29  }
  0x96   : > { %v401_v30 = vpop.permute.xlu0 %400  ;;  %v411_v38 = vpop.permute.xlu1 %410 }
  0x97   : > { %v418_v37 = vmul.f32 %v401_v30, %v1251_v33  ;;  %v420_v40 = vmul.f32 %v411_v38, %v1253_v34 }
  0x98   : > { %v457_v22 = vpop.permute.xlu2 %456 }
  0x9e   : > { %v406_v39 = vpop.permute.xlu0 %405  ;;  %v602_v45 = vpop.permute.xlu1 %601 }
  0x9f   : > { %v419_v41 = vmul.f32 %v406_v39, %v1255_v35 }
  0xa1   : > { %v422_v42 = vadd.f32 %v419_v41, %v418_v37  ;;  %v477_v37 = vpop.permute.xlu2 %476 }
  0xa3   : > { %v423_v43 = vadd.f32 %v422_v42, %v420_v40 }
  0xa6   : > { %v416_v52 = vpop.permute.xlu1 %415  ;;  %v597_v58 = vpop.permute.xlu0 %596 }
  0xa7   : > { %v421_v54 = vmul.f32 %v416_v52, %v1269_v50 }
  0xa9   : > { %v424_v63 = vadd.f32 %v423_v43, %v421_v54 }
  0xaa   : > { %v647_v47 = vpop.f32.mrf.mxu0 }
  0xab   : > { %v648_v59 = vadd.f32 %v647_v47, %v592_v57  ;;  %v425_v0 = vrot.slane %v424_v63, 4 }
  0xad   : > { %v426_v4 = vadd.f32 %v425_v0, %v424_v63 }
  0xae   : > { %v452_v15 = vpop.permute.xlu1 %451  ;;  %v447_v18 = vpop.permute.xlu0 %446 }
  0xaf   : > { %v427_v7 = vrot.slane %v426_v4, 2 }
  0xb0   : > { %v652_v49 = vpop.f32.mrf.mxu2 }
  0xb1   : > { %v653_v55 = vadd.f32 %v652_v49, %v602_v45  ;;  %v428_v11 = vadd.f32 %v427_v7, %v426_v4 }
  0xb2   : > { %v649_v56 = vpop.f32.mrf.mxu0 }
  0xb3   : > { %v650_v61 = vadd.f32 %v649_v56, %v597_v58  ;;  %981 = vtanh.f32 %v653_v55  ;;  %v429_v12 = vrot.slane %v428_v11, 1 }
  0xb5   : > { %v430_v13 = vadd.f32 %v429_v12, %v428_v11 }
  0xb7   : > { %v432_v16 = vmul.f32 %v430_v13, %v1255_v35  ;;  %v431_v17 = vmul.f32 %v430_v13, %v1251_v33  ;;  %v433_v21 = vmul.f32 %v430_v13, %v1253_v34  ;;  %v473_v23 = vpop.permute.xlu1 %472  ;;  %v469_v26 = vpop.permute.xlu0 %468  ;;  %v434_v28 = vmul.f32 %v430_v13, %v1269_v50 }
  0xb8   : > { %v654_v60 = vpop.f32.mrf.mxu2 }
  0xb9   : > { %v655_v62 = vadd.f32 %v654_v60, %v607_v48  ;;  %v982_v1 = vpop.eup %981  ;;  %v460_v19 = vadd.f32 %v447_v18, %v432_v16  ;;  %v459_v20 = vadd.f32 %v442_v14, %v431_v17  ;;  %v461_v27 = vadd.f32 %v452_v15, %v433_v21  ;;  %v502_v48 = vpop.permute.xlu2 %501 }
  0xba   : > { %v462_v32 = vadd.f32 %v457_v22, %v434_v28 }
  0xbb   : > { %983 = vtanh.f32 %v655_v62  ;;  %v464_v24 = vadd.f32 %v460_v19, %v1255_v35  ;;  %v463_v25 = vadd.f32 %v459_v20, %v1251_v33  ;;  %v465_v31 = vadd.f32 %v461_v27, %v1253_v34 }
  0xbc   : > { %985 = vtanh.f32 %v648_v59  ;;  %v466_v40 = vadd.f32 %v462_v32, %v1269_v50 }
  0xbd   : > { %987 = vtanh.f32 %v650_v61  ;;  %v484_v29 = vmul.f32 %v473_v23, %v464_v24  ;;  %v483_v30 = vmul.f32 %v469_v26, %v463_v25  ;;  %v485_v39 = vmul.f32 %v477_v37, %v465_v31 }
  0xbf   : > { %v487_v36 = vadd.f32 %v484_v29, %v483_v30  ;;  %v481_v38 = vpop.permute.xlu1 %480  ;;  %v506_v56 = vpop.permute.xlu0 %505 }
  0xc0   : > { %v486_v41 = vmul.f32 %v481_v38, %v466_v40 }
  0xc1   : > { %v984_v2 = vpop.eup %983  ;;  %v488_v42 = vadd.f32 %v487_v36, %v485_v39  ;;  %v514_v55 = vpop.permute.xlu2 %513 }
  0xc2   : > { %v986_v3 = vpop.eup %985  ;;  %v666_v5 = vpack.c.bf16 %v984_v2, %v982_v1 }
  0xc3   : > { %v988_v6 = vpop.eup %987  ;;  %v489_v43 = vadd.f32 %v488_v42, %v486_v41 }
  0xc4   : > { %713 = vmatpush.bf16.msra.mxu1 %v666_v5  ;;  %925 = vmatpush.bf16.msra.mxu3 %v666_v5  ;;  %v665_v8 = vpack.c.bf16 %v988_v6, %v986_v3 }
  0xc5   : > { %v490_v44 = vrot.slane %v489_v43, 4 }
  0xc7   : > { %v491_v45 = vadd.f32 %v490_v44, %v489_v43  ;;  %v510_v52 = vpop.permute.xlu1 %509 }
  0xc8   : > { %714 = vmatpush.bf16.msra.mxu1 %v665_v8  ;;  %926 = vmatpush.bf16.msra.mxu3 %v665_v8  ;;  %v526_v1 = vpop.permute.xlu0 %525 }
  0xc9   : > { %v492_v46 = vrot.slane %v491_v45, 2  ;;  %v534_v0 = vpop.permute.xlu2 %533 }
  0xcb   : > { %913 = vmatmul.msk.bf16.vlgmr.msra.gmra.mxu1 %vm631_vm0, %v921_v9  ;;  %914 = vmatmul.msk.bf16.vlgmr.msra.gmra.mxu3 %vm631_vm0, %v922_v10  ;;  %v493_v47 = vadd.f32 %v492_v46, %v491_v45 }
  0xcd   : > { %v494_v49 = vrot.slane %v493_v47, 1 }
  0xcf   : > { %v495_v51 = vadd.f32 %v494_v49, %v493_v47 }
  0xd0   : > { %v530_v62 = vpop.permute.xlu1 %529  ;;  %v563_v19 = vpop.permute.xlu0 %562 }
  0xd1   : > { %v497_v53 = vmul.f32 %v495_v51, %v1255_v35  ;;  %v496_v54 = vmul.f32 %v495_v51, %v1251_v33  ;;  %v498_v59 = vmul.f32 %v495_v51, %v1253_v34  ;;  %v499_v4 = vmul.f32 %v495_v51, %v1269_v50  ;;  %v559_v12 = vpop.permute.xlu2 %558 }
  0xd3   : > { %v517_v57 = vadd.f32 %v506_v56, %v497_v53  ;;  %v516_v58 = vadd.f32 %v502_v48, %v496_v54  ;;  %v518_v63 = vadd.f32 %v510_v52, %v498_v59  ;;  %v519_v7 = vadd.f32 %v514_v55, %v499_v4 }
  0xd5   : > { %v521_v60 = vadd.f32 %v517_v57, %v464_v24  ;;  %v520_v61 = vadd.f32 %v516_v58, %v463_v25  ;;  %v522_v5 = vadd.f32 %v518_v63, %v465_v31  ;;  %v523_v10 = vadd.f32 %v519_v7, %v466_v40 }
  0xd7   : > { %v541_v2 = vmul.f32 %v530_v62, %v521_v60  ;;  %v540_v3 = vmul.f32 %v526_v1, %v520_v61  ;;  %v542_v8 = vmul.f32 %v534_v0, %v522_v5 }
  0xd8   : > { %v538_v9 = vpop.permute.xlu1 %537 }
  0xd9   : > { %v544_v6 = vadd.f32 %v541_v2, %v540_v3  ;;  %v543_v13 = vmul.f32 %v538_v9, %v523_v10  ;;  %v571_v16 = vpop.permute.xlu2 %570  ;;  %v674_v24 = vpop.permute.xlu0 %673 }
  0xdb   : > { %v545_v11 = vadd.f32 %v544_v6, %v542_v8 }
  0xdd   : > { %v546_v14 = vadd.f32 %v545_v11, %v543_v13 }
  0xdf   : > { %v547_v15 = vrot.slane %v546_v14, 4 }
  0xe0   : > { %v567_v23 = vpop.permute.xlu1 %566 }
  0xe1   : > { %v548_v17 = vadd.f32 %v547_v15, %v546_v14  ;;  %v684_v21 = vpop.permute.xlu2 %683  ;;  %v742_v32 = vpop.permute.xlu0 %741 }
  0xe3   : > { %v549_v18 = vrot.slane %v548_v17, 2 }
  0xe5   : > { %v550_v20 = vadd.f32 %v549_v18, %v548_v17 }
  0xe7   : > { %v551_v22 = vrot.slane %v550_v20, 1 }
  0xe9   : > { %v552_v25 = vadd.f32 %v551_v22, %v550_v20  ;;  %v737_v26 = vpop.permute.xlu2 %736  ;;  %v679_v29 = vpop.permute.xlu1 %678 }
  0xea   : > { %v747_v47 = vpop.permute.xlu0 %746 }
  0xeb   : > { %v554_v27 = vmul.f32 %v552_v25, %v1255_v35  ;;  %v553_v28 = vmul.f32 %v552_v25, %v1251_v33  ;;  %v555_v36 = vmul.f32 %v552_v25, %v1253_v34  ;;  %v556_v41 = vmul.f32 %v552_v25, %v1269_v50 }
  0xed   : > { %v574_v30 = vadd.f32 %v563_v19, %v554_v27  ;;  %v573_v31 = vadd.f32 %v559_v12, %v553_v28  ;;  %v575_v40 = vadd.f32 %v567_v23, %v555_v36  ;;  %v576_v46 = vadd.f32 %v571_v16, %v556_v41 }
  0xef   : > { %v577_v37 = vadd.f32 %v573_v31, %v520_v61  ;;  %v578_v38 = vadd.f32 %v574_v30, %v521_v60  ;;  %v579_v35 = vadd.f32 %v575_v40, %v522_v5  ;;  %v580_v51 = vadd.f32 %v576_v46, %v523_v10 }
  0xf1   : > { %v779_v39 = vpop.permute.xlu2 %778  ;;  %v689_v43 = vpop.permute.xlu1 %688  ;;  %v754_v44 = vmul.f32 %v737_v26, %v577_v37  ;;  %v755_v45 = vmul.f32 %v742_v32, %v578_v38  ;;  %v756_v52 = vmul.f32 %v747_v47, %v579_v35 }
  0xf2   : > { %v789_v8 = vpop.permute.xlu0 %788 }
  0xf3   : > { %v758_v48 = vadd.f32 %v755_v45, %v754_v44 }
  0xf5   : > { %v759_v56 = vadd.f32 %v758_v48, %v756_v52 }
  0xf9   : > { %v752_v34 = vpop.permute.xlu2 %751  ;;  %v774_v57 = vpop.permute.xlu1 %773 }
  0xfa   : > { %v757_v50 = vmul.f32 %v752_v34, %v580_v51 }
  0xfc   : > { %v760_v58 = vadd.f32 %v759_v56, %v757_v50 }
  0xfe   : > { %v761_v63 = vrot.slane %v760_v58, 4 }
 0x100   : > { %v762_v5 = vadd.f32 %v761_v63, %v760_v58 }
 0x101   : > { %v784_v4 = vpop.permute.xlu1 %783 }
 0x102   : > { %v763_v11 = vrot.slane %v762_v5, 2 }
 0x104   : > { %v764_v14 = vadd.f32 %v763_v11, %v762_v5 }
 0x106   : > { %v765_v17 = vrot.slane %v764_v14, 1 }
 0x108   : > { %v766_v20 = vadd.f32 %v765_v17, %v764_v14 }
 0x148   : > { %v716_v42 = vpop.f32.mrf.mxu1 }
 0x149   : > { %v717_v33 = vadd.f32 %v716_v42, %v674_v24 }
 0x14b   : > { %989 = vtanh.f32 %v717_v33 }
 0x14e   : > { %v721_v49 = vpop.f32.mrf.mxu3 }
 0x14f   : > { %v722_v54 = vadd.f32 %v721_v49, %v684_v21 }
 0x150   : > { %v718_v53 = vpop.f32.mrf.mxu1 }
 0x151   : > { %v719_v55 = vadd.f32 %v718_v53, %v679_v29  ;;  %v990_v60 = vpop.eup %989 }
 0x152   : > { %v791_v0 = vmul.f32 %v990_v60, %v774_v57 }
 0x153   : > { %991 = vtanh.f32 %v719_v55 }
 0x154   : > { %993 = vtanh.f32 %v722_v54 }
 0x156   : > { %v723_v59 = vpop.f32.mrf.mxu3 }
 0x157   : > { %v724_v61 = vadd.f32 %v723_v59, %v689_v43 }
 0x159   : > { %v992_v62 = vpop.eup %991  ;;  %995 = vtanh.f32 %v724_v61 }
 0x15a   : > { %v792_v1 = vmul.f32 %v992_v62, %v779_v39  ;;  %v994_v2 = vpop.eup %993 }
 0x15b   : > { %v793_v6 = vmul.f32 %v994_v2, %v784_v4 }
 0x15c   : > { %v795_v3 = vadd.f32 %v792_v1, %v791_v0 }
 0x15e   : > { %v796_v10 = vadd.f32 %v795_v3, %v793_v6 }
 0x15f   : > { %v996_v7 = vpop.eup %995 }
 0x160   : > { %v794_v9 = vmul.f32 %v996_v7, %v789_v8 }
 0x162   : > { %v797_v12 = vadd.f32 %v796_v10, %v794_v9 }
 0x164   : > { %v798_v13 = vrot.slane %v797_v12, 4 }
 0x166   : > { %v799_v15 = vadd.f32 %v798_v13, %v797_v12 }
 0x168   : > { %v800_v16 = vrot.slane %v799_v15, 2 }
 0x16a   : > { %v801_v18 = vadd.f32 %v800_v16, %v799_v15 }
 0x16c   : > { %v802_v19 = vrot.slane %v801_v18, 1 }
 0x16e   : > { %v803_v21 = vadd.f32 %v802_v19, %v801_v18 }
 0x170   : > { %v804_v22 = vadd.f32 %v803_v21, %v766_v20 }
 0x172   : > { %805 = vst [vmem:[%s384_s26] sm:$0x1] %v804_v22 }
 0x173   : > { %1024 = shalt.err (!%p1021_p5)
}
 0x174   : > { %927 = dma.vmem_to_hbm [thread:$0]  (%p1152_p6), %s818_s27, 16, %s820_s28, %s807_s29  }
 0x175 PF: > { %s831_s17 = sand.u32 1, %s1047_s30   ;;  %p930_p7 = pnand %p882_p9, %p1156_p8 }
 0x176   : > { %s832_s25 = scalar_lea.sflag [#allocation4], %s831_s17 }
 0x177   : > { %p931_p10 = pneg %p930_p7 }
 0x179   : > { %1042 = dma.done.wait (%p931_p10), %s832_s25, 16  }
 0x17a   : > { %1044 = vsyncadd (%p931_p10), %s832_s25, 4294967280  ;;  %p19_p11 = scmp.ge.s32.totalorder %s1137_s15, 4   ;;  %s1349_s30 = smov %s1051_s10 }
 0x17b   : > { %s1350_s10 = smov %s1055_s11  ;;  %s1351_s11 = smov %s1150_s18 }
 0x17c   : > { %s1352_s12 = smov %s1137_s15  ;;  %21 = sbr.rel (!%p19_p11) target bundleno = 3 (0x3), region = 137 }
 0x181   :  { %837 = vsyncpa [#allocation4], 1 }
 0x182   :  { %839 = vsyncpa [#allocation4 + $0x1], 1 }

</bundles_post_ra>
